<compile_context>
chip_gen: v7x
topology: tpu7x:2x2x1
jax: 0.10.0
libtpu: 0.0.40
codegen_flags: <defaults>
</compile_context>

<pallas_src>
import functools

import jax
import jax.numpy as jnp
from jax.experimental import pallas as pl
from jax.experimental.pallas import tpu as pltpu


def _round_up(n, m):
    return ((n + m - 1) // m) * m


def _a2c_kernel(bf16_elementwise, approx_recip,
                x_ref, w1_ref, b1_ref, wh_ref, bh_ref, sel_ref, out_ref):
    """One batch tile of the fused A2C forward.

    x_ref  : (TB, OBS)        input tile (any float dtype; cast in-register)
    w1_ref : (OBS, HIDDEN)    base weight (f32 or bf16)
    b1_ref : (1, HIDDEN)      base bias (f32)
    wh_ref : (HIDDEN, N_PAD)  fused+padded head weight [Wmu | Wvar | Wv | 0...]
    bh_ref : (1, N_PAD)       fused+padded head bias (f32)
    sel_ref: (1, N_PAD) i32   per-column head id: 0=mu, 1=var, 2=value/padding
    out_ref: (TB, N_PAD)      fused lane-dense output (f32 or bf16)
    """
    # Cast x to the matmul dtype in-register (no extra HBM pass in the wrapper).
    x = x_ref[...].astype(w1_ref.dtype)

    # Base: Linear + ReLU (f32 MXU accumulation, f32 bias / ReLU).
    base = jnp.dot(x, w1_ref[...], preferred_element_type=jnp.float32) + b1_ref[...]
    base = jnp.maximum(base, 0.0)

    # Single fused head matmul (mu | var | value | zero padding).
    y = jnp.dot(base.astype(wh_ref.dtype), wh_ref[...],
                preferred_element_type=jnp.float32) + bh_ref[...]
    if bf16_elementwise:
        # v6e/v7x have bf16 VPU/EUP: packs 16 rows/vreg, halving elementwise work.
        y = y.astype(jnp.bfloat16)

    # Shared-exp activations: e = exp(-|y|) feeds BOTH softplus and tanh, so the
    # single-slot EUP sees ~2 transcendentals per element instead of 3.
    e = jnp.exp(-jnp.abs(y))
    softplus_y = jnp.maximum(y, 0.0) + jnp.log1p(e)      # stable softplus
    e2 = e * e
    num = 1.0 - e2
    den = 1.0 + e2
    if approx_recip:
        inv = pl.reciprocal(den.astype(jnp.float32), approx=True).astype(y.dtype)
        t = num * inv
    else:
        t = num / den
    tanh_y = jnp.where(y < 0.0, -t, t)                    # tanh(y) = sign(y)*(1-e^2)/(1+e^2)

    # Per-column head select using the precomputed resident selector
    # (avoids a per-step iota): 0 -> tanh, 1 -> softplus, else identity.
    sel = jnp.broadcast_to(sel_ref[...], y.shape)
    out = jnp.where(sel == 0, tanh_y, jnp.where(sel == 1, softplus_y, y))
    out_ref[...] = out.astype(out_ref.dtype)


def prepare_params(params, *, use_bf16=False):
    """One-time param preparation (fused/padded head weights + selector mask).

    Call when params change, NOT per forward step.  `use_bf16=True` stores the
    matmul weights in bf16 (fine on v5e/v6e/v7x: bf16 MXU inputs with f32
    accumulation); biases stay f32.
    """
    act = params["wmu"].shape[1]
    n_heads = 2 * act + 1
    n_pad = max(128, _round_up(n_heads, 128))     # lane-dense fused output width

    wh = jnp.concatenate([params["wmu"], params["wvar"], params["wv"]], axis=1)
    bh = jnp.concatenate([params["bmu"], params["bvar"], params["bv"]], axis=1)
    wh = jnp.pad(wh, ((0, 0), (0, n_pad - n_heads)))
    bh = jnp.pad(bh, ((0, 0), (0, n_pad - n_heads))).astype(jnp.float32)

    w1 = params["w1"]
    b1 = params["b1"].astype(jnp.float32)
    if use_bf16:
        w1 = w1.astype(jnp.bfloat16)
        wh = wh.astype(jnp.bfloat16)

    col = jnp.arange(n_pad, dtype=jnp.int32)
    head_sel = jnp.where(col < act, 0,
                         jnp.where(col < 2 * act, 1, 2)).astype(jnp.int32)[None, :]

    return dict(w1=w1, b1=b1, wh=wh, bh=bh, head_sel=head_sel)


def continuous_a2c_forward(x, prepared, *, act_size, block_b=1024,
                           bf16_elementwise=False, approx_recip=False,
                           single_buffer_weights=False):
    """ContinuousA2C forward as one fused Pallas kernel.

    x: (B, obs_size) float array; prepared: output of prepare_params().
    Returns (mu (B,A), var (B,A), value (B,1)) as float32.
    """
    w1, b1, wh, bh, head_sel = (prepared["w1"], prepared["b1"], prepared["wh"],
                                prepared["bh"], prepared["head_sel"])
    B, obs = x.shape
    obs_w, hidden = w1.shape
    assert obs == obs_w
    n_pad = wh.shape[1]
    n_heads = 2 * act_size + 1
    use_bf16 = wh.dtype == jnp.bfloat16
    out_dtype = jnp.bfloat16 if use_bf16 else jnp.float32

    # --- batch tiling ------------------------------------------------------
    tb = min(block_b, B)
    if B >= 1024:
        # >= 2 grid steps so v7x's second TensorCore has work and the x/out
        # tiles pipeline against compute; ~4 steps amortizes ~0.35us/step.
        tb = min(tb, pl.cdiv(B, 4))
    if tb != B:
        tb = max(8, (tb // 8) * 8)      # sublane multiple (full-dim blocks exempt)
    grid_b = pl.cdiv(B, tb)             # ragged last block handled by Pallas masking

    # --- compiler params (scoped-VMEM limit only when actually needed) -----
    w_itemsize = jnp.dtype(w1.dtype).itemsize
    out_itemsize = jnp.dtype(out_dtype).itemsize
    wbuf = 1 if single_buffer_weights else 2
    vmem_est = (2 * tb * obs * jnp.dtype(x.dtype).itemsize      # x tiles (double buffered)
                + 2 * tb * n_pad * out_itemsize                 # out tiles (double buffered)
                + wbuf * ((obs * hidden + hidden * n_pad) * w_itemsize
                          + (hidden + 2 * n_pad) * 4)           # b1, bh, head_sel
                + 8 * tb * max(hidden, n_pad))                  # f32 intermediates headroom
    ck = dict(dimension_semantics=("parallel",))
    if vmem_est > 12 * (1 << 20):
        # Defaults are 16 MiB (v5e) / 32 MiB (v6e, v7x); cap at 64 MiB so the
        # same config still fits v7x's 64 MiB physical VMEM.
        ck["vmem_limit_bytes"] = int(min(2 * vmem_est, 64 * (1 << 20)))

    def resident(shape):
        # Constant block index across the grid -> one VMEM copy is enough.
        if single_buffer_weights:
            return pl.BlockSpec(shape, lambda i: (0, 0), pipeline_mode=pl.Buffered(1))
        return pl.BlockSpec(shape, lambda i: (0, 0))

    kernel = functools.partial(_a2c_kernel, bf16_elementwise, approx_recip)
    cost = pl.CostEstimate(
        flops=int(2 * B * (obs * hidden + hidden * n_pad)),
        transcendentals=int(2 * B * n_pad),                     # exp + log1p per element
        bytes_accessed=int(B * obs * jnp.dtype(x.dtype).itemsize
                           + (obs * hidden + hidden * n_pad) * w_itemsize
                           + (hidden + 2 * n_pad) * 4
                           + B * n_pad * out_itemsize),
    )

    fused = pl.pallas_call(
        kernel,
        out_shape=jax.ShapeDtypeStruct((B, n_pad), out_dtype),
        grid=(grid_b,),
        in_specs=[
            pl.BlockSpec((tb, obs), lambda i: (i, 0)),   # x: batch-tiled, pipelined
            resident((obs, hidden)),                     # W1
            resident((1, hidden)),                       # b1
            resident((hidden, n_pad)),                   # [Wmu | Wvar | Wv | 0]
            resident((1, n_pad)),                        # fused head bias
            resident((1, n_pad)),                        # per-column head selector
        ],
        out_specs=pl.BlockSpec((tb, n_pad), lambda i: (i, 0)),
        compiler_params=pltpu.CompilerParams(**ck),
        cost_estimate=cost,
    )(x, w1, b1, wh, bh, head_sel)

    # Slice the heads apart outside the kernel (cheap XLA slices), upcast to f32.
    mu = fused[:, :act_size].astype(jnp.float32)
    var = fused[:, act_size:2 * act_size].astype(jnp.float32)
    value = fused[:, 2 * act_size:n_heads].astype(jnp.float32)
    return mu, var, value


def init_params(key, obs_size, act_size, hidden):
    """Deterministic init mimicking nn.Linear default U(-1/sqrt(fan_in), 1/sqrt(fan_in))."""
    ks = jax.random.split(key, 8)

    def linear(kw, kb, fan_in, fan_out):
        bound = 1.0 / jnp.sqrt(fan_in)
        w = jax.random.uniform(kw, (fan_in, fan_out), jnp.float32, -bound, bound)
        b = jax.random.uniform(kb, (1, fan_out), jnp.float32, -bound, bound)
        return w, b

    w1, b1 = linear(ks[0], ks[1], obs_size, hidden)
    wmu, bmu = linear(ks[2], ks[3], hidden, act_size)
    wvar, bvar = linear(ks[4], ks[5], hidden, act_size)
    wv, bv = linear(ks[6], ks[7], hidden, 1)
    return dict(w1=w1, b1=b1, wmu=wmu, bmu=bmu, wvar=wvar, bvar=bvar, wv=wv, bv=bv)


def _reference(x, params):
    base = jnp.maximum(x @ params["w1"] + params["b1"], 0.0)
    mu = jnp.tanh(base @ params["wmu"] + params["bmu"])
    var = jax.nn.softplus(base @ params["wvar"] + params["bvar"])
    val = base @ params["wv"] + params["bv"]
    return mu, var, val


if __name__ == "__main__":
    key = jax.random.PRNGKey(0)
    k_x, k_p, k_x2 = jax.random.split(key, 3)

    B, OBS, ACT, HIDDEN = 8, 16, 4, 32
    x = jax.random.normal(k_x, (B, OBS), dtype=jnp.float32)
    params = init_params(k_p, OBS, ACT, HIDDEN)

    # One-time param preparation (done when params change, not per step).
    prep_f32 = prepare_params(params, use_bf16=False)
    prep_bf16 = prepare_params(params, use_bf16=True)

    mu_ref, var_ref, val_ref = _reference(x, params)

    # 1) Default f32 path — strict correctness check vs pure-JAX reference.
    fwd = jax.jit(functools.partial(continuous_a2c_forward, act_size=ACT))
    mu, var, value = fwd(x, prep_f32)
    jax.block_until_ready((mu, var, value))
    assert mu.shape == (B, ACT) and var.shape == (B, ACT) and value.shape == (B, 1)
    assert jnp.allclose(mu, mu_ref, atol=1e-5)
    assert jnp.allclose(var, var_ref, atol=1e-5)
    assert jnp.allclose(value, val_ref, atol=1e-5)

    # 2) Ragged batch (no wrapper-side padding of x; masked last block).
    B2 = 11
    x2 = jax.random.normal(k_x2, (B2, OBS), dtype=jnp.float32)
    mu2_ref, var2_ref, val2_ref = _reference(x2, params)
    mu2, var2, val2 = fwd(x2, prep_f32)
    jax.block_until_ready((mu2, var2, val2))
    assert mu2.shape == (B2, ACT)
    assert jnp.allclose(mu2, mu2_ref, atol=1e-5)
    assert jnp.allclose(var2, var2_ref, atol=1e-5)
    assert jnp.allclose(val2, val2_ref, atol=1e-5)

    # 3) Approximate-reciprocal tanh (EUP vrcp) — slightly looser tolerance.
    fwd_ap = jax.jit(functools.partial(continuous_a2c_forward, act_size=ACT,
                                       approx_recip=True))
    mu_a, var_a, val_a = fwd_ap(x, prep_f32)
    jax.block_until_ready((mu_a, var_a, val_a))
    assert jnp.allclose(mu_a, mu_ref, atol=2e-3)
    assert jnp.allclose(var_a, var_ref, atol=2e-3)
    assert jnp.allclose(val_a, val_ref, atol=2e-3)

    # 4) bf16 weights + bf16 fused output (halves writeback) — loose tolerance.
    fwd_bf16 = jax.jit(functools.partial(continuous_a2c_forward, act_size=ACT))
    mu_b, var_b, val_b = fwd_bf16(x, prep_bf16)
    jax.block_until_ready((mu_b, var_b, val_b))
    assert jnp.allclose(mu_b, mu_ref, atol=3e-2)
    assert jnp.allclose(var_b, var_ref, atol=3e-2)
    assert jnp.allclose(val_b, val_ref, atol=3e-2)

    # 5) Optional fast paths, probed defensively (support varies by chip/jax):
    #    bf16 elementwise activations (v6e/v7x EUP/VPU) and single-buffered
    #    resident weights via pl.Buffered(1).
    try:
        fwd_fast = jax.jit(functools.partial(
            continuous_a2c_forward, act_size=ACT,
            bf16_elementwise=True, approx_recip=True))
        r = fwd_fast(x, prep_bf16)
        jax.block_until_ready(r)
        assert jnp.allclose(r[0], mu_ref, atol=1e-1)
    except Exception:
        pass  # TODO(synk): bf16-elementwise path unsupported on this chip/jax version.
    try:
        fwd_sb = jax.jit(functools.partial(
            continuous_a2c_forward, act_size=ACT, single_buffer_weights=True))
        r = fwd_sb(x, prep_f32)
        jax.block_until_ready(r)
        assert jnp.allclose(r[0], mu_ref, atol=1e-5)
    except Exception:
        pass  # TODO(synk): pipeline_mode=pl.Buffered(1) unsupported on this jax version.

    print("KERNEL_OK")
</pallas_src>

<mosaic_0001>
module attributes {stable_mosaic.version = 11 : i64} {
  func.func @_a2c_kernel(%arg0: i32, %arg1: memref<8x16xf32, #tpu.memory_space<vmem>>, %arg2: memref<16x32xf32, #tpu.memory_space<vmem>>, %arg3: memref<1x32xf32, #tpu.memory_space<vmem>>, %arg4: memref<32x128xf32, #tpu.memory_space<vmem>>, %arg5: memref<1x128xf32, #tpu.memory_space<vmem>>, %arg6: memref<1x128xi32, #tpu.memory_space<vmem>>, %arg7: memref<8x128xf32, #tpu.memory_space<vmem>>) attributes {dimension_semantics = [#tpu.dimension_semantics<parallel>], iteration_bounds = array<i64: 1>, scalar_prefetch = 0 : i64, scratch_operands = 0 : i64, tpu.core_type = #tpu.core_type<tc>, window_params = [{transform_indices = @transform_0, window_bounds = array<i64: 8, 16>}, {pipeline_mode = #tpu.pipeline_mode<synchronous>, transform_indices = @transform_1, window_bounds = array<i64: 16, 32>}, {pipeline_mode = #tpu.pipeline_mode<synchronous>, transform_indices = @transform_2, window_bounds = array<i64: 1, 32>}, {pipeline_mode = #tpu.pipeline_mode<synchronous>, transform_indices = @transform_3, window_bounds = array<i64: 32, 128>}, {pipeline_mode = #tpu.pipeline_mode<synchronous>, transform_indices = @transform_4, window_bounds = array<i64: 1, 128>}, {pipeline_mode = #tpu.pipeline_mode<synchronous>, transform_indices = @transform_5, window_bounds = array<i64: 1, 128>}, {transform_indices = @transform_6, window_bounds = array<i64: 8, 128>}]} {
    %c0 = arith.constant 0 : index
    %c0_0 = arith.constant 0 : index
    %0 = vector.load %arg1[%c0, %c0_0] : memref<8x16xf32, #tpu.memory_space<vmem>>, vector<8x16xf32>
    %c0_1 = arith.constant 0 : index
    %c0_2 = arith.constant 0 : index
    %1 = vector.load %arg2[%c0_1, %c0_2] : memref<16x32xf32, #tpu.memory_space<vmem>>, vector<16x32xf32>
    %cst = arith.constant dense<0.000000e+00> : vector<8x32xf32>
    %2 = tpu.matmul %0, %1, %cst {dimension_numbers = #tpu.dot_dimension_numbers<[1], [0], [0], [1], [0, 0, 1, 1], [], []>} : vector<8x16xf32>, vector<16x32xf32>, vector<8x32xf32> -> vector<8x32xf32>
    %c0_3 = arith.constant 0 : index
    %c0_4 = arith.constant 0 : index
    %3 = vector.load %arg3[%c0_3, %c0_4] : memref<1x32xf32, #tpu.memory_space<vmem>>, vector<1x32xf32>
    %4 = vector.broadcast %3 : vector<1x32xf32> to vector<8x32xf32>
    %5 = arith.addf %2, %4 : vector<8x32xf32>
    %cst_5 = arith.constant 0.000000e+00 : f32
    %6 = vector.broadcast %cst_5 : f32 to vector<8x32xf32>
    %7 = arith.maximumf %5, %6 : vector<8x32xf32>
    %c0_6 = arith.constant 0 : index
    %c0_7 = arith.constant 0 : index
    %8 = vector.load %arg4[%c0_6, %c0_7] : memref<32x128xf32, #tpu.memory_space<vmem>>, vector<32x128xf32>
    %cst_8 = arith.constant dense<0.000000e+00> : vector<8x128xf32>
    %9 = tpu.matmul %7, %8, %cst_8 {dimension_numbers = #tpu.dot_dimension_numbers<[1], [0], [0], [1], [0, 0, 1, 1], [], []>} : vector<8x32xf32>, vector<32x128xf32>, vector<8x128xf32> -> vector<8x128xf32>
    %c0_9 = arith.constant 0 : index
    %c0_10 = arith.constant 0 : index
    %10 = vector.load %arg5[%c0_9, %c0_10] : memref<1x128xf32, #tpu.memory_space<vmem>>, vector<1x128xf32>
    %11 = vector.broadcast %10 : vector<1x128xf32> to vector<8x128xf32>
    %12 = arith.addf %9, %11 : vector<8x128xf32>
    %13 = math.absf %12 : vector<8x128xf32>
    %cst_11 = arith.constant 0.000000e+00 : f32
    %14 = vector.broadcast %cst_11 : f32 to vector<8x128xf32>
    %15 = arith.subf %14, %13 : vector<8x128xf32>
    %16 = math.exp %15 : vector<8x128xf32>
    %cst_12 = arith.constant 0.000000e+00 : f32
    %17 = vector.broadcast %cst_12 : f32 to vector<8x128xf32>
    %18 = arith.maximumf %12, %17 : vector<8x128xf32>
    %19 = math.log1p %16 : vector<8x128xf32>
    %20 = arith.addf %18, %19 : vector<8x128xf32>
    %21 = arith.mulf %16, %16 : vector<8x128xf32>
    %cst_13 = arith.constant 1.000000e+00 : f32
    %22 = vector.broadcast %cst_13 : f32 to vector<8x128xf32>
    %23 = arith.subf %22, %21 : vector<8x128xf32>
    %cst_14 = arith.constant 1.000000e+00 : f32
    %24 = vector.broadcast %cst_14 : f32 to vector<8x128xf32>
    %25 = arith.addf %24, %21 : vector<8x128xf32>
    %26 = arith.divf %23, %25 : vector<8x128xf32>
    %cst_15 = arith.constant 0.000000e+00 : f32
    %27 = vector.broadcast %cst_15 : f32 to vector<8x128xf32>
    %28 = arith.cmpf olt, %12, %27 : vector<8x128xf32>
    %cst_16 = arith.constant 0.000000e+00 : f32
    %29 = vector.broadcast %cst_16 : f32 to vector<8x128xf32>
    %30 = arith.subf %29, %26 : vector<8x128xf32>
    %31 = arith.select %28, %30, %26 : vector<8x128xi1>, vector<8x128xf32>
    %c0_17 = arith.constant 0 : index
    %c0_18 = arith.constant 0 : index
    %32 = vector.load %arg6[%c0_17, %c0_18] : memref<1x128xi32, #tpu.memory_space<vmem>>, vector<1x128xi32>
    %33 = vector.shape_cast %32 : vector<1x128xi32> to vector<1x128xi32>
    %34 = vector.broadcast %33 : vector<1x128xi32> to vector<8x128xi32>
    %c0_i32 = arith.constant 0 : i32
    %35 = vector.broadcast %c0_i32 : i32 to vector<8x128xi32>
    %36 = arith.cmpi eq, %34, %35 : vector<8x128xi32>
    %c1_i32 = arith.constant 1 : i32
    %37 = vector.broadcast %c1_i32 : i32 to vector<8x128xi32>
    %38 = arith.cmpi eq, %34, %37 : vector<8x128xi32>
    %39 = arith.select %38, %20, %12 : vector<8x128xi1>, vector<8x128xf32>
    %40 = arith.select %36, %31, %39 : vector<8x128xi1>, vector<8x128xf32>
    %c0_19 = arith.constant 0 : index
    %c0_20 = arith.constant 0 : index
    %41 = vector.load %arg7[%c0_19, %c0_20] : memref<8x128xf32, #tpu.memory_space<vmem>>, vector<8x128xf32>
    tpu.vector_store %arg7[%c0_19, %c0_20], %40 {strides = array<i32>} : memref<8x128xf32, #tpu.memory_space<vmem>>, vector<8x128xf32>,
    return
  }
  func.func @transform_0(%arg0: i32) -> (i32, i32) {
    %c0_i32 = arith.constant 0 : i32
    %c0_i32_0 = arith.constant 0 : i32
    return %arg0, %c0_i32 : i32, i32
  }
  func.func @transform_1(%arg0: i32) -> (i32, i32) {
    %c0_i32 = arith.constant 0 : i32
    %c0_i32_0 = arith.constant 0 : i32
    %c0_i32_1 = arith.constant 0 : i32
    return %c0_i32, %c0_i32_0 : i32, i32
  }
  func.func @transform_2(%arg0: i32) -> (i32, i32) {
    %c0_i32 = arith.constant 0 : i32
    %c0_i32_0 = arith.constant 0 : i32
    %c0_i32_1 = arith.constant 0 : i32
    return %c0_i32, %c0_i32_0 : i32, i32
  }
  func.func @transform_3(%arg0: i32) -> (i32, i32) {
    %c0_i32 = arith.constant 0 : i32
    %c0_i32_0 = arith.constant 0 : i32
    %c0_i32_1 = arith.constant 0 : i32
    return %c0_i32, %c0_i32_0 : i32, i32
  }
  func.func @transform_4(%arg0: i32) -> (i32, i32) {
    %c0_i32 = arith.constant 0 : i32
    %c0_i32_0 = arith.constant 0 : i32
    %c0_i32_1 = arith.constant 0 : i32
    return %c0_i32, %c0_i32_0 : i32, i32
  }
  func.func @transform_5(%arg0: i32) -> (i32, i32) {
    %c0_i32 = arith.constant 0 : i32
    %c0_i32_0 = arith.constant 0 : i32
    %c0_i32_1 = arith.constant 0 : i32
    return %c0_i32, %c0_i32_0 : i32, i32
  }
  func.func @transform_6(%arg0: i32) -> (i32, i32) {
    %c0_i32 = arith.constant 0 : i32
    %c0_i32_0 = arith.constant 0 : i32
    return %arg0, %c0_i32 : i32, i32
  }
}

</mosaic_0001>

<bundles_post_ra>
// kernel: continuous_a2c_forward.1
= control target key start
LH: loop header
LB: loop body
LE: loop exit
PB: predicated region body
PF: predicated region fallthrough
CT: control target
= control target key end

     0   :  { %11 = vsyncpa [#allocation3], 0  ;;  %s492_s0 = inlined_call_operand.hbm [shape: f32[8,16], index: 0, kind: input, shape index: {}]   ;;  %s493_s1 = inlined_call_operand.hbm [shape: f32[16,32], index: 1, kind: input, shape index: {}]   ;;  %s494_s2 = inlined_call_operand.vmem [shape: f32[1,32], index: 2, kind: input, shape index: {}]   ;;  %s495_s3 = inlined_call_operand.hbm [shape: f32[32,128], index: 3, kind: input, shape index: {}]   ;;  %s496_s4 = inlined_call_operand.vmem [shape: f32[1,128], index: 4, kind: input, shape index: {}]   ;;  %s497_s5 = inlined_call_operand.vmem [shape: s32[1,128], index: 5, kind: input, shape index: {}]   ;;  %s498_s6 = inlined_call_operand.vmem [shape: f32[8,128], index: 6, kind: output, shape index: {}]  }
   0x1   :  { %12 = vsyncpa [#allocation5], 0  ;;  %s395_s21 = smov [#allocation4]   ;;  %s325_s25 = scalar_lea.hbm %s493_s1, 256 }
   0x2   :  { %s28_s22 = sshll.u32 %s395_s21, 4  ;;  %p326_p0 = scmp.ne.s32.totalorder %s493_s1, %s325_s25  ;;  %s29_s22 = int_to_ptr.vmem [resolvable:$true] %s28_s22 }
   0x3   :  { %p329_p1 = scmp.lt.u32.totalorder %s325_s25, %s493_s1 }
   0x5   :  { %p331_p2 = pnand %p329_p1, %p326_p0 }
   0x7   :  { %334 = shalt.err (!%p331_p2)
}
   0x8   :  { %s335_s30 = scalar_lea.vmem %s29_s22, 256  ;;  %p340_p4 = scmp.lt.s32.totalorder %s29_s22, %s29_s22 }
   0x9   :  { %p336_p3 = scmp.ne.s32.totalorder %s29_s22, %s335_s30  ;;  %p341_p5 = scmp.lt.s32.totalorder %s335_s30, %s335_s30 }
   0xb   :  { %p342_p6 = por %p341_p5, %p340_p4 }
   0xd   :  { %p343_p7 = pnand %p342_p6, %p336_p3 }
   0xf   :  { %346 = shalt.err (!%p343_p7)
}
  0x10   :  { %s396_s7 = smov 128   ;;  %s397_s8 = smov 8  }
  0x11   :  { %34 = dma.hbm_to_vmem [thread:$0]  %s493_s1, 256, %s29_s22, [#allocation5], %s396_s7, %s396_s7, %s397_s8  }
  0x12   :  { %s398_s11 = smov [#allocation2]   ;;  %s399_s13 = smov [#allocation6]  }
  0x13   :  { %s19_s12 = sshll.u32 %s398_s11, 4  ;;  %s42_s14 = sshll.u32 %s399_s13, 4  ;;  %s20_s12 = int_to_ptr.vmem [resolvable:$true] %s19_s12  ;;  %s43_s14 = int_to_ptr.vmem [resolvable:$true] %s42_s14 }
  0x14   :  { %s347_s17 = scalar_lea.hbm %s492_s0, 128 }
  0x15   :  { %p348_p8 = scmp.ne.s32.totalorder %s492_s0, %s347_s17  ;;  %p351_p9 = scmp.lt.u32.totalorder %s347_s17, %s492_s0 }
  0x17   :  { %p353_p10 = pnand %p351_p9, %p348_p8 }
  0x19   :  { %356 = shalt.err (!%p353_p10)
}
  0x1a   :  { %s357_s1 = scalar_lea.vmem %s20_s12, 128  ;;  %p362_p12 = scmp.lt.s32.totalorder %s20_s12, %s20_s12 }
  0x1b   :  { %p358_p11 = scmp.ne.s32.totalorder %s20_s12, %s357_s1  ;;  %p363_p13 = scmp.lt.s32.totalorder %s357_s1, %s357_s1 }
  0x1d   :  { %p364_p0 = por %p363_p13, %p362_p12 }
  0x1f   :  { %p365_p1 = pnand %p364_p0, %p358_p11 }
  0x21   :  { %368 = shalt.err (!%p365_p1)
}
  0x22   :  { %22 = dma.hbm_to_vmem [thread:$0]  %s492_s0, 128, %s20_s12, [#allocation3]  }
  0x23   :  { %s369_s26 = scalar_lea.hbm %s495_s3, 512 }
  0x24   :  { %p370_p2 = scmp.ne.s32.totalorder %s495_s3, %s369_s26  ;;  %p373_p3 = scmp.lt.u32.totalorder %s369_s26, %s495_s3 }
  0x26   :  { %p375_p4 = pnand %p373_p3, %p370_p2 }
  0x28   :  { %378 = shalt.err (!%p375_p4)
}
  0x29   :  { %s379_s9 = scalar_lea.vmem %s43_s14, 512  ;;  %p384_p6 = scmp.lt.s32.totalorder %s43_s14, %s43_s14 }
  0x2a   :  { %p380_p5 = scmp.ne.s32.totalorder %s43_s14, %s379_s9  ;;  %p385_p7 = scmp.lt.s32.totalorder %s379_s9, %s379_s9 }
  0x2c   :  { %p386_p8 = por %p385_p7, %p384_p6 }
  0x2e   :  { %p387_p9 = pnand %p386_p8, %p380_p5 }
  0x30   :  { %390 = shalt.err (!%p387_p9)
}
  0x31   :  { %48 = dma.hbm_to_vmem [thread:$0]  %s495_s3, 512, %s43_s14, [#allocation5], %s396_s7, %s396_s7, %s397_s8  }
  0x32   :  { %391 = dma.done.wait [#allocation3], 128  }
  0x33   :  { %392 = vsyncadd [#allocation3], 4294967168 }
  0x34   :  { %393 = dma.done.wait [#allocation5], 768  }
  0x35   :  { %394 = vsyncadd [#allocation5], 4294966528  ;;  %v400_v0 = vmov 0.0|0.0   ;;  %vm401_vm0 = vmmov 0   ;;  %v402_v1 = vmov 0.0   ;;  %v63_v2 = vld [vmem:[#allocation4] sm:$0xff] }
  0x36   :  { %302 = vmatprep.subr.bf16.mxu0 %v400_v0  ;;  %288 = vmatprep.mubr.msk.f32.mxu0 %vm401_vm0, %v402_v1  ;;  %v64_v3 = vld [vmem:[#allocation4 + $0x8] sm:$0xff]  ;;  %v147_v5 = vld [vmem:[#allocation6] sm:$0xff]  ;;  %v148_v6 = vld [vmem:[#allocation6 + $0x8] sm:$0xff]  ;;  %vm72_vm1 = vcmask 130048   ;;  %vm158_vm2 = vcmask 261120  }
  0x37   :  { %305 = vmatprep.subr.bf16.mxu1 %v400_v0  ;;  %299 = vmatprep.mubr.msk.f32.mxu1 %vm401_vm0, %v402_v1  ;;  %v303_v4 = vpack.c.bf16 %v64_v3, %v63_v2  ;;  %v306_v7 = vpack.c.bf16 %v148_v6, %v147_v5  ;;  %v62_v8 = vld [vmem:[#allocation2] sm:$0xff]  ;;  %v149_v9 = vld [vmem:[#allocation6 + $0x10] sm:$0xff]  ;;  %v150_v10 = vld [vmem:[#allocation6 + $0x18] sm:$0xff] }
  0x38   :  { %v309_v11 = vpack.c.bf16 %v150_v10, %v149_v9  ;;  %v271_v12 = vld [vmem:[%s494_s2] ss:$0 sm:$0xff] }
  0x39   :  { %304 = vmatpush3.bf16.msra.mxu0 %v303_v4  ;;  %307 = vmatpush3.bf16.msra.mxu1 %v306_v7  ;;  %v273_v17 = vld [vmem:[%s496_s4] ss:$0 sm:$0xff] }
  0x3a   :  { %308 = vmatprep.subr.bf16.mxu1 %v400_v0  ;;  %v275_v32 = vld [vmem:[%s497_s5] ss:$0 sm:$0xff] }
  0x3b   :  { %vm261_vm4 = vcmp.eq.s32.totalorder %v275_v32, 1  ;;  %vm260_vm5 = vcmp.eq.s32.totalorder %v275_v32, 0 }
  0x3c   :  { %289 = vmatmul.mubr.msk.f32.vlgmr.msra.gmra.mrb[0].mxu0 %vm72_vm1, %v62_v8 }
  0x3d   :  { %310 = vmatpush3.bf16.msra.mxu1 %v309_v11 }
 0x10f   :  { %v142_v13 = vpop.f32.mrb[0].mxu0 }
 0x110   :  { %v143_v14 = vadd.f32 %v271_v12, %v142_v13  ;;  %v290_v15 = vpop.f32.mrb[1].mxu0 }
 0x112   :  { %v146_v16 = vmax.f32 %v143_v14, 0.0 }
 0x114   :  { %300 = vmatmul.mubr.msk.f32.vlgmr.msra.gmra.mrb[0].mxu1 %vm158_vm2, %v146_v16 }
 0x1e7   :  { %v228_v18 = vpop.f32.mrb[0].mxu1 }
 0x1e8   :  { %v229_v19 = vadd.f32 %v273_v17, %v228_v18  ;;  %v301_v20 = vpop.f32.mrb[1].mxu1 }
 0x1ea   :  { %v232_v21 = vand.u32 2147483647, %v229_v19  ;;  %v236_v35 = vmax.f32 %v229_v19, 0.0  ;;  %vm252_vm6 = vcmp.lt.f32.partialorder %v229_v19, 0.0 }
 0x1ec   :  { %v233_v22 = vsub.f32 0.0, %v232_v21 }
 0x1ee   :  { %v234_v23 = vmul.f32 1.442695, %v233_v22 }
 0x1f0   :  { %319 = vpow2.f32 %v234_v23 }
 0x1fa   :  { %v320_v24 = vpop.eup %319 }
 0x1fb   :  { %v237_v25 = vadd.f32 1.0, %v320_v24  ;;  %v247_v26 = vmul.f32 %v320_v24, %v320_v24  ;;  %v240_v28 = vmul.f32 -0.5, %v320_v24  ;;  %v243_v30 = vand.u32 2147483647, %v320_v24 }
 0x1fd   :  { %321 = vlog2.f32 %v237_v25  ;;  %v249_v27 = vadd.f32 1.0, %v247_v26  ;;  %v241_v29 = vadd.f32 1.0, %v240_v28  ;;  %vm244_vm3 = vcmp.lt.f32.partialorder %v243_v30, 0.0004427343 }
 0x1fe   :  { %v248_v36 = vsub.f32 1.0, %v247_v26 }
 0x1ff   :  { %323 = vrcp.f32 %v249_v27  ;;  %v242_v34 = vmul.f32 %v320_v24, %v241_v29 }
 0x207   :  { %v322_v31 = vpop.eup %321 }
 0x208   :  { %v239_v33 = vmul.f32 0.6931472, %v322_v31 }
 0x209   :  { %v324_v37 = vpop.eup %323 }
 0x20a   :  { %v245_v38 = vsel %vm244_vm3, %v242_v34, %v239_v33  ;;  %v251_v40 = vmul.f32 %v324_v37, %v248_v36 }
 0x20b   :  { %v246_v39 = vadd.f32 %v245_v38, %v236_v35 }
 0x20c   :  { %v253_v41 = vsub.f32 0.0, %v251_v40 }
 0x20d   :  { %v262_v42 = vsel %vm261_vm4, %v246_v39, %v229_v19 }
 0x20e   :  { %v254_v43 = vsel %vm252_vm6, %v253_v41, %v251_v40 }
 0x20f   :  { %v263_v44 = vsel %vm260_vm5, %v254_v43, %v262_v42 }
 0x210   :  { %264 = vst [vmem:[%s498_s6] sm:$0xff] %v263_v44 }
 0x211   :  { %269 = vsyncpa [#allocation3], 1 }
 0x212   :  { %270 = vsyncpa [#allocation5], 1 }

</bundles_post_ra>
